<compile_context>
chip_gen: v7x
topology: tpu7x:2x2x1
jax: 0.10.0
libtpu: 0.0.40
codegen_flags: <defaults>
</compile_context>

<pallas_src>
import jax
import jax.numpy as jnp
from jax.experimental import pallas as pl
from jax.experimental.pallas import tpu as pltpu

IN_FEATURES = 189
OUT_FEATURES = 1

# Generation-agnostic default; sweep 8192-16384 (v7x), 4096-8192 (v6e),
# 2048-4096 (v5e) if tuning for a specific part.
DEFAULT_TILE_B = 8192
MIN_TILE_B = 1024  # below this, grid-step overhead dominates -> single block.


def _round_up(v, m):
    return ((v + m - 1) // m) * m


def linear_relu_kernel(x_ref, w_ref, b_ref, o_ref):
    # x_ref: (tb, 189) VMEM      w_ref: (1, 189) VMEM (single vreg row)
    # b_ref: (1,) SMEM scalar    o_ref: (tb, 1) VMEM
    xv = x_ref[...].astype(jnp.float32)          # no-op for f32 x; enables bf16 x
    prod = xv * w_ref[...]                       # VPU elementwise, (1,189) bcast
    y = jnp.sum(prod, axis=-1, keepdims=True)    # XLU cross-lane reduce -> (tb,1)
    y = y + b_ref[0]                             # scalar SMEM read, VPU broadcast
    o_ref[...] = jnp.maximum(y, 0.0).astype(o_ref.dtype)


def simple_nn_forward(x, w, b, *, tile_b=DEFAULT_TILE_B, x_dtype=None):
    """y = relu(x @ w.T + b).

    x: (B, 189)   w: (1, 189) (PyTorch nn.Linear (out, in) layout)   b: (1,)
    Returns (B, 1) float32.

    x_dtype: optionally cast x at the boundary (e.g. jnp.bfloat16) to halve
    the HBM read stream; accumulation stays f32 in the kernel.  Default None
    preserves PyTorch f32 numerics.
    """
    if x_dtype is not None:
        x = x.astype(x_dtype)
    B = x.shape[0]

    if B <= MIN_TILE_B:
        # Single full-batch block (a full-extent block dim is always legal).
        tb = B
    else:
        # Large tiles amortize per-step overhead, but keep >= ~4 grid steps so
        # both v7x TensorCores get work and double-buffering stays effective.
        # tb stays a multiple of 8 (sublane requirement for a partial block).
        tb = min(tile_b, max(MIN_TILE_B, _round_up(pl.cdiv(B, 4), 8)))
    grid = (pl.cdiv(B, tb),)

    return pl.pallas_call(
        linear_relu_kernel,
        out_shape=jax.ShapeDtypeStruct((B, OUT_FEATURES), jnp.float32),
        grid=grid,
        in_specs=[
            # x: tiled over batch, pipelined/double-buffered by Pallas.  OOB
            # rows of a partial last tile only feed OOB output rows, which the
            # store masks, so no padding copy of x is needed.
            pl.BlockSpec((tb, IN_FEATURES), lambda i: (i, 0)),
            # w: same (1, 189) block every step -> stays resident in VMEM.
            pl.BlockSpec((OUT_FEATURES, IN_FEATURES), lambda i: (0, 0)),
            # bias: whole (1,) array in SMEM, read as a scalar in the kernel.
            pl.BlockSpec(memory_space=pltpu.MemorySpace.SMEM),
        ],
        out_specs=pl.BlockSpec((tb, OUT_FEATURES), lambda i: (i, 0)),
        compiler_params=pltpu.CompilerParams(
            # Batch tiles are independent -> shard across TensorCores (v7x).
            dimension_semantics=("parallel",),
            # Only binds once double-buffered x far exceeds the default tile;
            # keeps headroom under v7x's 64 MiB physical VMEM.
            vmem_limit_bytes=48 * 1024 * 1024,
        ),
    )(x, w, b)


if __name__ == "__main__":
    key = jax.random.PRNGKey(0)
    k_x, k_w, k_b, k_x2 = jax.random.split(key, 4)

    # Deterministic init mimicking PyTorch's default nn.Linear init:
    # uniform(-1/sqrt(in_features), 1/sqrt(in_features)); weight is (out, in).
    bound = 1.0 / jnp.sqrt(jnp.float32(IN_FEATURES))
    w = jax.random.uniform(k_w, (OUT_FEATURES, IN_FEATURES),
                           dtype=jnp.float32, minval=-bound, maxval=bound)
    b = jax.random.uniform(k_b, (OUT_FEATURES,),
                           dtype=jnp.float32, minval=-bound, maxval=bound)

    def ref_fn(xx):
        # Pure-JAX reference with the same f32 multiply + reduce arithmetic.
        return jnp.maximum(jnp.sum(xx * w, axis=-1, keepdims=True) + b, 0.0)

    # Small batch: exercises the single-block path.
    B = 16
    x = jax.random.normal(k_x, (B, IN_FEATURES), dtype=jnp.float32)
    out = simple_nn_forward(x, w, b)
    jax.block_until_ready(out)
    assert out.shape == (B, OUT_FEATURES)
    assert jnp.allclose(out, ref_fn(x), atol=1e-4, rtol=1e-4)

    # Moderate batch: exercises the tiled grid + partial last block path.
    B2 = 2500  # not a multiple of the tile -> partial (masked) last block
    x2 = jax.random.normal(k_x2, (B2, IN_FEATURES), dtype=jnp.float32)
    out2 = simple_nn_forward(x2, w, b)
    jax.block_until_ready(out2)
    assert out2.shape == (B2, OUT_FEATURES)
    assert jnp.allclose(out2, ref_fn(x2), atol=1e-4, rtol=1e-4)

    print("KERNEL_OK")
</pallas_src>

<mosaic_0001>
module attributes {stable_mosaic.version = 11 : i64} {
  func.func @linear_relu_kernel(%arg0: i32, %arg1: memref<16x189xf32, #tpu.memory_space<vmem>>, %arg2: memref<1x189xf32, #tpu.memory_space<vmem>>, %arg3: memref<1xf32, #tpu.memory_space<smem>>, %arg4: memref<16x1xf32, #tpu.memory_space<vmem>>) attributes {dimension_semantics = [#tpu.dimension_semantics<parallel>], iteration_bounds = array<i64: 1>, scalar_prefetch = 0 : i64, scratch_operands = 0 : i64, tpu.core_type = #tpu.core_type<tc>, window_params = [{transform_indices = @transform_0, window_bounds = array<i64: 16, 189>}, {pipeline_mode = #tpu.pipeline_mode<synchronous>, transform_indices = @transform_1, window_bounds = array<i64: 1, 189>}, {transform_indices = @transform_2, window_bounds = array<i64: 1>}, {transform_indices = @transform_3, window_bounds = array<i64: 16, 1>}]} {
    %c0 = arith.constant 0 : index
    %c0_0 = arith.constant 0 : index
    %0 = vector.load %arg1[%c0, %c0_0] : memref<16x189xf32, #tpu.memory_space<vmem>>, vector<16x189xf32>
    %c0_1 = arith.constant 0 : index
    %c0_2 = arith.constant 0 : index
    %1 = vector.load %arg2[%c0_1, %c0_2] : memref<1x189xf32, #tpu.memory_space<vmem>>, vector<1x189xf32>
    %2 = vector.broadcast %1 : vector<1x189xf32> to vector<16x189xf32>
    %3 = arith.mulf %0, %2 : vector<16x189xf32>
    %cst = arith.constant dense<0.000000e+00> : vector<16xf32>
    %4 = vector.multi_reduction <add>, %3, %cst [1] : vector<16x189xf32> to vector<16xf32>
    %5 = vector.shape_cast %4 : vector<16xf32> to vector<16x1xf32>
    %c0_3 = arith.constant 0 : index
    %6 = memref.load %arg3[%c0_3] : memref<1xf32, #tpu.memory_space<smem>>
    %7 = vector.broadcast %6 : f32 to vector<16x1xf32>
    %8 = arith.addf %5, %7 : vector<16x1xf32>
    %cst_4 = arith.constant 0.000000e+00 : f32
    %9 = vector.broadcast %cst_4 : f32 to vector<16x1xf32>
    %10 = arith.maximumf %8, %9 : vector<16x1xf32>
    %c0_5 = arith.constant 0 : index
    %c0_6 = arith.constant 0 : index
    %11 = vector.load %arg4[%c0_5, %c0_6] : memref<16x1xf32, #tpu.memory_space<vmem>>, vector<16x1xf32>
    tpu.vector_store %arg4[%c0_5, %c0_6], %10 {strides = array<i32>} : memref<16x1xf32, #tpu.memory_space<vmem>>, vector<16x1xf32>,
    return
  }
  func.func @transform_0(%arg0: i32) -> (i32, i32) {
    %c0_i32 = arith.constant 0 : i32
    %c0_i32_0 = arith.constant 0 : i32
    return %arg0, %c0_i32 : i32, i32
  }
  func.func @transform_1(%arg0: i32) -> (i32, i32) {
    %c0_i32 = arith.constant 0 : i32
    %c0_i32_0 = arith.constant 0 : i32
    %c0_i32_1 = arith.constant 0 : i32
    return %c0_i32, %c0_i32_0 : i32, i32
  }
  func.func @transform_2(%arg0: i32) -> i32 {
    %c0_i32 = arith.constant 0 : i32
    %c0_i32_0 = arith.constant 0 : i32
    return %c0_i32 : i32
  }
  func.func @transform_3(%arg0: i32) -> (i32, i32) {
    %c0_i32 = arith.constant 0 : i32
    %c0_i32_0 = arith.constant 0 : i32
    return %arg0, %c0_i32 : i32, i32
  }
}

</mosaic_0001>

<bundles_post_ra>
// kernel: tpu_custom_call.1
= control target key start
LH: loop header
LB: loop body
LE: loop exit
PB: predicated region body
PF: predicated region fallthrough
CT: control target
= control target key end

     0   :  { %9 = vsyncpa [#allocation4], 0  ;;  %s99_s12 = smov [#allocation3]   ;;  %s146_s0 = inlined_call_operand.hbm [shape: f32[16,189], index: 0, kind: input, shape index: {}]   ;;  %s147_s1 = inlined_call_operand.vmem [shape: f32[1,189], index: 1, kind: input, shape index: {}]   ;;  %s148_s2 = inlined_call_operand.<no memory space> [shape: f32[1], index: 2, kind: input, shape index: {}]   ;;  %s149_s3 = inlined_call_operand.vmem [shape: f32[16,1], index: 3, kind: output, shape index: {}]  }
   0x1   :  { %s15_s13 = sshll.u32 %s99_s12, 4  ;;  %s75_s16 = scalar_lea.hbm %s146_s0, 512  ;;  %s16_s13 = int_to_ptr.vmem [resolvable:$true] %s15_s13 }
   0x2   :  { %p76_p0 = scmp.ne.s32.totalorder %s146_s0, %s75_s16  ;;  %p79_p1 = scmp.lt.u32.totalorder %s75_s16, %s146_s0 }
   0x4   :  { %p81_p2 = pnand %p79_p1, %p76_p0 }
   0x6   :  { %84 = shalt.err (!%p81_p2)
}
   0x7   :  { %s85_s21 = scalar_lea.vmem %s16_s13, 512  ;;  %p90_p4 = scmp.lt.s32.totalorder %s16_s13, %s16_s13 }
   0x8   :  { %p86_p3 = scmp.ne.s32.totalorder %s16_s13, %s85_s21  ;;  %p91_p5 = scmp.lt.s32.totalorder %s85_s21, %s85_s21 }
   0xa   :  { %p92_p6 = por %p91_p5, %p90_p4 }
   0xc   :  { %p93_p7 = pnand %p92_p6, %p86_p3 }
   0xe   :  { %96 = shalt.err (!%p93_p7)
}
   0xf   :  { %s100_s22 = smov 256   ;;  %s101_s23 = smov 16  }
  0x10   :  { %21 = dma.hbm_to_vmem [thread:$0]  %s146_s0, 512, %s16_s13, [#allocation4], %s100_s22, %s100_s22, %s101_s23  }
  0x11   :  { %97 = dma.done.wait [#allocation4], 512  }
  0x12   :  { %98 = vsyncadd [#allocation4], 4294966784  ;;  %v35_v0 = vlaneseq  ;;  %v29_v4 = vld [vmem:[#allocation3] sm:$0xff]  ;;  %v30_v5 = vld [vmem:[#allocation3 + $0x8] sm:$0xff]  ;;  %vm49_vm0 = vcmask 498688   ;;  %v59_v19 = vstv %s148_s2  ;;  %vm64_vm1 = vcmask 7168  }
  0x13   :  { %v33_v6 = vld [vmem:[%s147_s1] sm:$0x3]  ;;  %v31_v9 = vld [vmem:[#allocation3 + $0x10] sm:$0xff]  ;;  %v32_v10 = vld [vmem:[#allocation3 + $0x18] sm:$0xff] }
  0x14   :  { %v36_v1 = vshrl.u32 %v35_v0, 7 }
  0x16   :  { %v37_v2 = vsub.s32 0, %v36_v1  ;;  %v41_v3 = vsub.s32 1, %v36_v1 }
  0x18   :  { %v38_v7 = vrot.slane %v33_v6, %v37_v2  ;;  %v42_v8 = vrot.slane %v33_v6, %v41_v3 }
  0x1a   :  { %v45_v11 = vmul.f32 %v38_v7, %v29_v4  ;;  %v46_v12 = vmul.f32 %v42_v8, %v30_v5  ;;  %v48_v13 = vmul.f32 %v42_v8, %v32_v10  ;;  %v47_v14 = vmul.f32 %v38_v7, %v31_v9 }
  0x1c   :  { %v50_v15 = vsel %vm49_vm0, %v46_v12, 0.0  ;;  %v54_v16 = vsel %vm49_vm0, %v48_v13, 0.0 }
  0x1d   :  { %v51_v17 = vadd.f32 %v50_v15, %v45_v11  ;;  %v55_v18 = vadd.f32 %v54_v16, %v47_v14 }
  0x1f   :  { %52 = vadd.xlane.f32.xlu0 %v51_v17 }
  0x23   :  { %56 = vadd.xlane.f32.xlu0 %v55_v18 }
  0xac   :  { %v53_v20 = vpop.xlane.xlu0 %52 }
  0xad   :  { %v60_v21 = vadd.f32 %v59_v19, %v53_v20 }
  0xaf   :  { %v62_v22 = vmax.f32 %v60_v21, 0.0 }
  0xb0   :  { %v57_v23 = vpop.xlane.xlu0 %56 }
  0xb1   :  { %65 = vst.msk [vmem:[%s149_s3] sm:$0xff] %vm64_vm1, %v62_v22  ;;  %v61_v24 = vadd.f32 %v59_v19, %v57_v23 }
  0xb3   :  { %v63_v25 = vmax.f32 %v61_v24, 0.0 }
  0xb5   :  { %66 = vst.msk [vmem:[%s149_s3 + $0x8] sm:$0xff] %vm64_vm1, %v63_v25 }
  0xb6   :  { %71 = vsyncpa [#allocation4], 1 }

</bundles_post_ra>
